<compile_context>
chip_gen: v7x
topology: tpu7x:2x2x1
jax: 0.10.0
libtpu: 0.0.40
codegen_flags: <defaults>
</compile_context>

<pallas_src>
import functools

import numpy as np
import jax
import jax.numpy as jnp
from jax.experimental import pallas as pl
from jax.experimental.pallas import tpu as pltpu


# ---------------------------------------------------------------------------
# Kernel 1: fused LayerNorm + QKV projection (runs once per token tile).
# ---------------------------------------------------------------------------
def _qkv_proj_kernel(x_ref, gamma_ref, beta_ref, wqkv_ref,
                     q_ref, k_ref, v_ref,
                     *, heads, dim_head, eps, scale, mm_dtype):
    inner = heads * dim_head

    x = x_ref[0].astype(jnp.float32)                       # (T, D)
    gamma = gamma_ref[0].astype(jnp.float32)                # (D,)
    beta = beta_ref[0].astype(jnp.float32)                  # (D,)

    mean = jnp.mean(x, axis=-1, keepdims=True)
    xc = x - mean
    var = jnp.mean(xc * xc, axis=-1, keepdims=True)
    xn = (xc * jax.lax.rsqrt(var + eps)) * gamma[None, :] + beta[None, :]
    xn = xn.astype(mm_dtype)

    qkv = jnp.dot(xn, wqkv_ref[...].astype(mm_dtype),
                  preferred_element_type=jnp.float32)       # (T, 3*inner)
    t = qkv.shape[0]

    # Single head-split relayout per token tile (O(N) total).  The flash
    # kernel below consumes q/k/v straight from HBM with no transposes.
    q = qkv[:, :inner].reshape(t, heads, dim_head) * scale  # scale folded here
    k = qkv[:, inner:2 * inner].reshape(t, heads, dim_head)
    v = qkv[:, 2 * inner:].reshape(t, heads, dim_head)
    q_ref[0] = jnp.transpose(q, (1, 0, 2)).astype(q_ref.dtype)   # (h, T, dh)
    k_ref[0] = jnp.transpose(k, (1, 0, 2)).astype(k_ref.dtype)
    v_ref[0] = jnp.transpose(v, (1, 0, 2)).astype(v_ref.dtype)


# ---------------------------------------------------------------------------
# Kernel 2: flash attention (online softmax), one (batch*head) per grid row.
# ---------------------------------------------------------------------------
def _flash_kernel(q_ref, k_ref, v_ref, o_ref, m_s, l_s, acc_s,
                  *, kv_tile, n_valid, mask_keys, mm_dtype):
    ki = pl.program_id(2)

    @pl.when(ki == 0)
    def _init():
        m_s[...] = jnp.full_like(m_s, -jnp.inf)
        l_s[...] = jnp.zeros_like(l_s)
        acc_s[...] = jnp.zeros_like(acc_s)

    q = q_ref[0].astype(mm_dtype)            # (TQ, dh), softmax scale pre-folded
    k = k_ref[0].astype(mm_dtype)            # (TK, dh)
    v = v_ref[0].astype(mm_dtype)            # (TK, dh)

    # scores: contract dh of q with dh of k -- no transpose materialized.
    s = jax.lax.dot_general(q, k, (((1,), (1,)), ((), ())),
                            preferred_element_type=jnp.float32)   # (TQ, TK)

    if mask_keys:  # static (trace-time) flag: sequence was padded
        col = ki * kv_tile + jax.lax.broadcasted_iota(jnp.int32, s.shape, 1)
        s = jnp.where(col < n_valid, s, -1e30)

    m_prev = m_s[...]
    m_new = jnp.maximum(m_prev, jnp.max(s, axis=-1, keepdims=True))
    alpha = jnp.exp(m_prev - m_new)
    p = jnp.exp(s - m_new)
    l_s[...] = alpha * l_s[...] + jnp.sum(p, axis=-1, keepdims=True)
    acc_s[...] = alpha * acc_s[...] + jnp.dot(
        p.astype(mm_dtype), v, preferred_element_type=jnp.float32)
    m_s[...] = m_new

    @pl.when(ki == pl.num_programs(2) - 1)
    def _finalize():
        o_ref[0] = (acc_s[...] * pl.reciprocal(l_s[...], approx=True)
                    ).astype(o_ref.dtype)


# ---------------------------------------------------------------------------
# Kernel 3: merge heads + output projection.
# ---------------------------------------------------------------------------
def _out_proj_kernel(a_ref, wout_ref, o_ref, *, mm_dtype):
    a = a_ref[0]                                            # (heads, T, dh)
    h, t, dh = a.shape
    a = jnp.transpose(a, (1, 0, 2)).reshape(t, h * dh)      # (T, inner), once/tile
    y = jnp.dot(a.astype(mm_dtype), wout_ref[...].astype(mm_dtype),
                preferred_element_type=jnp.float32)          # (T, D), lane-dense
    o_ref[0] = y.astype(o_ref.dtype)


# ---------------------------------------------------------------------------
# Wrapper
# ---------------------------------------------------------------------------
def attention_forward(x, gamma, beta, w_qkv, w_out, *, heads, dim_head,
                      tile=256, use_bf16_matmul=False):
    """Forward pass equivalent to the PyTorch Attention module.

    tile: token tile size (default 256 for v6e/v7x 256-wide MXU; use 128 on v5e).
    use_bf16_matmul: cast matmul operands to bf16 (f32 accumulation). Off by
    default to keep exact f32 parity with the reference.
    """
    B, N, D = x.shape
    inner = heads * dim_head
    assert w_qkv.shape == (D, 3 * inner)
    assert w_out.shape == (inner, D)

    mm_dtype = jnp.bfloat16 if (use_bf16_matmul or x.dtype == jnp.bfloat16) \
        else jnp.float32
    itemsize = int(np.dtype(mm_dtype).itemsize)

    # --- tile selection + padding (always keeps the (8,128)-friendly path) ---
    if N >= tile:
        T = tile
    else:
        T = max(8, ((N + 7) // 8) * 8)
    n_pad = pl.cdiv(N, T) * T            # padding amount is always < T
    if n_pad != N:
        x_p = jnp.pad(x, ((0, 0), (0, n_pad - N), (0, 0)))
    else:
        x_p = x

    # ---------------- 1) LN + QKV projection prologue ----------------------
    qkv_out = jax.ShapeDtypeStruct((B, heads, n_pad, dim_head), mm_dtype)
    qkv_kernel = functools.partial(
        _qkv_proj_kernel, heads=heads, dim_head=dim_head, eps=1e-5,
        scale=dim_head ** (-0.5), mm_dtype=mm_dtype)

    q, k, v = pl.pallas_call(
        qkv_kernel,
        out_shape=(qkv_out, qkv_out, qkv_out),
        grid=(B, n_pad // T),
        in_specs=[
            pl.BlockSpec((1, T, D), lambda b, t: (b, t, 0)),          # x
            pl.BlockSpec((1, D), lambda b, t: (0, 0)),                # gamma
            pl.BlockSpec((1, D), lambda b, t: (0, 0)),                # beta
            pl.BlockSpec((D, 3 * inner), lambda b, t: (0, 0)),        # w_qkv
        ],
        out_specs=(
            pl.BlockSpec((1, heads, T, dim_head), lambda b, t: (b, 0, t, 0)),
            pl.BlockSpec((1, heads, T, dim_head), lambda b, t: (b, 0, t, 0)),
            pl.BlockSpec((1, heads, T, dim_head), lambda b, t: (b, 0, t, 0)),
        ),
        compiler_params=pltpu.CompilerParams(
            dimension_semantics=("parallel", "parallel")),
        cost_estimate=pl.CostEstimate(
            flops=2 * B * n_pad * D * 3 * inner,
            transcendentals=B * n_pad,
            bytes_accessed=int(x_p.size * x_p.dtype.itemsize
                               + w_qkv.size * w_qkv.dtype.itemsize
                               + 3 * B * heads * n_pad * dim_head * itemsize)),
    )(x_p, gamma.reshape(1, D), beta.reshape(1, D), w_qkv)

    # ---------------- 2) flash attention over (B*heads) --------------------
    bh = B * heads
    q_f = q.reshape(bh, n_pad, dim_head)
    k_f = k.reshape(bh, n_pad, dim_head)
    v_f = v.reshape(bh, n_pad, dim_head)
    kv_steps = n_pad // T

    flash_kernel = functools.partial(
        _flash_kernel, kv_tile=T, n_valid=N, mask_keys=(n_pad != N),
        mm_dtype=mm_dtype)

    attn_out = pl.pallas_call(
        flash_kernel,
        out_shape=jax.ShapeDtypeStruct((bh, n_pad, dim_head), x.dtype),
        grid=(bh, n_pad // T, kv_steps),
        in_specs=[
            pl.BlockSpec((1, T, dim_head), lambda b, qi, ki: (b, qi, 0)),  # q
            pl.BlockSpec((1, T, dim_head), lambda b, qi, ki: (b, ki, 0)),  # k
            pl.BlockSpec((1, T, dim_head), lambda b, qi, ki: (b, ki, 0)),  # v
        ],
        out_specs=pl.BlockSpec((1, T, dim_head), lambda b, qi, ki: (b, qi, 0)),
        scratch_shapes=[
            pltpu.VMEM((T, 1), jnp.float32),            # running max
            pltpu.VMEM((T, 1), jnp.float32),            # running denom
            pltpu.VMEM((T, dim_head), jnp.float32),     # output accumulator
        ],
        compiler_params=pltpu.CompilerParams(
            dimension_semantics=("parallel", "parallel", "arbitrary")),
        cost_estimate=pl.CostEstimate(
            flops=4 * bh * n_pad * n_pad * dim_head,
            transcendentals=bh * n_pad * n_pad,
            bytes_accessed=int((q_f.size + (k_f.size + v_f.size) * kv_steps
                                + bh * n_pad * dim_head) * itemsize)),
    )(q_f, k_f, v_f)

    # ---------------- 3) merge heads + output projection -------------------
    attn_out = attn_out.reshape(B, heads, n_pad, dim_head)
    out_kernel = functools.partial(_out_proj_kernel, mm_dtype=mm_dtype)

    y = pl.pallas_call(
        out_kernel,
        out_shape=jax.ShapeDtypeStruct((B, n_pad, D), x.dtype),
        grid=(B, n_pad // T),
        in_specs=[
            pl.BlockSpec((1, heads, T, dim_head), lambda b, t: (b, 0, t, 0)),
            pl.BlockSpec((inner, D), lambda b, t: (0, 0)),            # w_out
        ],
        out_specs=pl.BlockSpec((1, T, D), lambda b, t: (b, t, 0)),
        compiler_params=pltpu.CompilerParams(
            dimension_semantics=("parallel", "parallel")),
        cost_estimate=pl.CostEstimate(
            flops=2 * B * n_pad * inner * D,
            transcendentals=0,
            bytes_accessed=int((B * n_pad * inner + inner * D
                                + B * n_pad * D) * 4)),
    )(attn_out, w_out)

    return y if n_pad == N else y[:, :N, :]


# ---------------------------------------------------------------------------
# Pure-JAX reference mirroring the PyTorch forward.
# ---------------------------------------------------------------------------
def attention_reference(x, gamma, beta, w_qkv, w_out, *, heads, dim_head):
    xf = x.astype(jnp.float32)
    mean = jnp.mean(xf, axis=-1, keepdims=True)
    var = jnp.mean((xf - mean) ** 2, axis=-1, keepdims=True)
    xn = (xf - mean) / jnp.sqrt(var + 1e-5) * gamma + beta
    qkv = xn @ w_qkv
    inner = heads * dim_head
    q, k, v = jnp.split(qkv, 3, axis=-1)

    def split_heads(t):
        B, N, _ = t.shape
        return t.reshape(B, N, heads, dim_head).transpose(0, 2, 1, 3)

    q, k, v = map(split_heads, (q, k, v))
    dots = jnp.einsum('bhnd,bhmd->bhnm', q, k) * dim_head ** (-0.5)
    attn = jax.nn.softmax(dots, axis=-1)
    out = jnp.einsum('bhnm,bhmd->bhnd', attn, v)
    out = out.transpose(0, 2, 1, 3).reshape(x.shape[0], x.shape[1], inner)
    return out @ w_out


if __name__ == "__main__":
    # Small shapes consistent with the module.
    heads, dim_head = 4, 16
    inner = heads * dim_head

    key = jax.random.PRNGKey(0)
    kx, kq, ko, kg, kb, kx2 = jax.random.split(key, 6)

    # Case 1: N multiple of 8 (no padding path).
    B, N, D = 2, 8, 32
    x = jax.random.normal(kx, (B, N, D), dtype=jnp.float32)
    # Deterministic synthetic parameters (not loading a checkpoint).
    w_qkv = jax.random.normal(kq, (D, 3 * inner), dtype=jnp.float32) * 0.05
    w_out = jax.random.normal(ko, (inner, D), dtype=jnp.float32) * 0.05
    gamma = jnp.ones((D,), dtype=jnp.float32) + 0.1 * jax.random.normal(kg, (D,))
    beta = 0.1 * jax.random.normal(kb, (D,), dtype=jnp.float32)

    y = attention_forward(x, gamma, beta, w_qkv, w_out,
                          heads=heads, dim_head=dim_head)
    y = jax.block_until_ready(y)
    y_ref = attention_reference(x, gamma, beta, w_qkv, w_out,
                                heads=heads, dim_head=dim_head)
    assert jnp.allclose(y, y_ref, atol=2e-3, rtol=2e-3), "mismatch vs reference"

    # Case 2: N not a multiple of the tile (exercises padding + key masking).
    N2 = 12
    x2 = jax.random.normal(kx2, (B, N2, D), dtype=jnp.float32)
    y2 = attention_forward(x2, gamma, beta, w_qkv, w_out,
                           heads=heads, dim_head=dim_head)
    y2 = jax.block_until_ready(y2)
    y2_ref = attention_reference(x2, gamma, beta, w_qkv, w_out,
                                 heads=heads, dim_head=dim_head)
    assert jnp.allclose(y2, y2_ref, atol=2e-3, rtol=2e-3), \
        "mismatch vs reference (padded case)"

    print("KERNEL_OK")
</pallas_src>

<mosaic_0001>
module attributes {stable_mosaic.version = 11 : i64} {
  func.func @_qkv_proj_kernel(%arg0: i32, %arg1: i32, %arg2: memref<1x8x32xf32, #tpu.memory_space<vmem>>, %arg3: memref<1x32xf32, #tpu.memory_space<vmem>>, %arg4: memref<1x32xf32, #tpu.memory_space<vmem>>, %arg5: memref<32x192xf32, #tpu.memory_space<vmem>>, %arg6: memref<1x4x8x16xf32, #tpu.memory_space<vmem>>, %arg7: memref<1x4x8x16xf32, #tpu.memory_space<vmem>>, %arg8: memref<1x4x8x16xf32, #tpu.memory_space<vmem>>) attributes {dimension_semantics = [#tpu.dimension_semantics<parallel>, #tpu.dimension_semantics<parallel>], iteration_bounds = array<i64: 2, 1>, scalar_prefetch = 0 : i64, scratch_operands = 0 : i64, tpu.core_type = #tpu.core_type<tc>, window_params = [{transform_indices = @transform_0, window_bounds = array<i64: 1, 8, 32>}, {pipeline_mode = #tpu.pipeline_mode<synchronous>, transform_indices = @transform_1, window_bounds = array<i64: 1, 32>}, {pipeline_mode = #tpu.pipeline_mode<synchronous>, transform_indices = @transform_2, window_bounds = array<i64: 1, 32>}, {pipeline_mode = #tpu.pipeline_mode<synchronous>, transform_indices = @transform_3, window_bounds = array<i64: 32, 192>}, {transform_indices = @transform_4, window_bounds = array<i64: 1, 4, 8, 16>}, {transform_indices = @transform_5, window_bounds = array<i64: 1, 4, 8, 16>}, {transform_indices = @transform_6, window_bounds = array<i64: 1, 4, 8, 16>}]} {
    %c0 = arith.constant 0 : index
    %c0_0 = arith.constant 0 : index
    %c0_1 = arith.constant 0 : index
    %0 = vector.load %arg2[%c0, %c0_0, %c0_1] : memref<1x8x32xf32, #tpu.memory_space<vmem>>, vector<1x8x32xf32>
    %1 = vector.shape_cast %0 : vector<1x8x32xf32> to vector<8x32xf32>
    %c0_2 = arith.constant 0 : index
    %c0_3 = arith.constant 0 : index
    %2 = vector.load %arg3[%c0_2, %c0_3] : memref<1x32xf32, #tpu.memory_space<vmem>>, vector<1x32xf32>
    %3 = vector.shape_cast %2 : vector<1x32xf32> to vector<32xf32>
    %c0_4 = arith.constant 0 : index
    %c0_5 = arith.constant 0 : index
    %4 = vector.load %arg4[%c0_4, %c0_5] : memref<1x32xf32, #tpu.memory_space<vmem>>, vector<1x32xf32>
    %5 = vector.shape_cast %4 : vector<1x32xf32> to vector<32xf32>
    %cst = arith.constant dense<0.000000e+00> : vector<8xf32>
    %6 = vector.multi_reduction <add>, %1, %cst [1] : vector<8x32xf32> to vector<8xf32>
    %7 = vector.shape_cast %6 : vector<8xf32> to vector<8x1xf32>
    %cst_6 = arith.constant 3.200000e+01 : f32
    %8 = vector.broadcast %cst_6 : f32 to vector<8x1xf32>
    %9 = arith.divf %7, %8 : vector<8x1xf32>
    %10 = vector.broadcast %9 : vector<8x1xf32> to vector<8x32xf32>
    %11 = arith.subf %1, %10 : vector<8x32xf32>
    %12 = arith.mulf %11, %11 : vector<8x32xf32>
    %cst_7 = arith.constant dense<0.000000e+00> : vector<8xf32>
    %13 = vector.multi_reduction <add>, %12, %cst_7 [1] : vector<8x32xf32> to vector<8xf32>
    %14 = vector.shape_cast %13 : vector<8xf32> to vector<8x1xf32>
    %cst_8 = arith.constant 3.200000e+01 : f32
    %15 = vector.broadcast %cst_8 : f32 to vector<8x1xf32>
    %16 = arith.divf %14, %15 : vector<8x1xf32>
    %cst_9 = arith.constant 9.99999974E-6 : f32
    %17 = vector.broadcast %cst_9 : f32 to vector<8x1xf32>
    %18 = arith.addf %16, %17 : vector<8x1xf32>
    %19 = math.rsqrt %18 : vector<8x1xf32>
    %20 = vector.broadcast %19 : vector<8x1xf32> to vector<8x32xf32>
    %21 = arith.mulf %11, %20 : vector<8x32xf32>
    %22 = vector.shape_cast %3 : vector<32xf32> to vector<1x32xf32>
    %23 = vector.broadcast %22 : vector<1x32xf32> to vector<8x32xf32>
    %24 = arith.mulf %21, %23 : vector<8x32xf32>
    %25 = vector.shape_cast %5 : vector<32xf32> to vector<1x32xf32>
    %26 = vector.broadcast %25 : vector<1x32xf32> to vector<8x32xf32>
    %27 = arith.addf %24, %26 : vector<8x32xf32>
    %c0_10 = arith.constant 0 : index
    %c0_11 = arith.constant 0 : index
    %28 = vector.load %arg5[%c0_10, %c0_11] : memref<32x192xf32, #tpu.memory_space<vmem>>, vector<32x192xf32>
    %cst_12 = arith.constant dense<0.000000e+00> : vector<8x192xf32>
    %29 = tpu.matmul %27, %28, %cst_12 {dimension_numbers = #tpu.dot_dimension_numbers<[1], [0], [0], [1], [0, 0, 1, 1], [], []>} : vector<8x32xf32>, vector<32x192xf32>, vector<8x192xf32> -> vector<8x192xf32>
    %30 = vector.extract_strided_slice %29 {offsets = [0, 0], sizes = [8, 64], strides = [1, 1]} : vector<8x192xf32> to vector<8x64xf32>
    %31 = vector.shape_cast %30 : vector<8x64xf32> to vector<8x4x16xf32>
    %cst_13 = arith.constant 2.500000e-01 : f32
    %32 = vector.broadcast %cst_13 : f32 to vector<8x4x16xf32>
    %33 = arith.mulf %31, %32 : vector<8x4x16xf32>
    %34 = vector.extract_strided_slice %29 {offsets = [0, 64], sizes = [8, 64], strides = [1, 1]} : vector<8x192xf32> to vector<8x64xf32>
    %35 = vector.shape_cast %34 : vector<8x64xf32> to vector<8x4x16xf32>
    %36 = vector.extract_strided_slice %29 {offsets = [0, 128], sizes = [8, 64], strides = [1, 1]} : vector<8x192xf32> to vector<8x64xf32>
    %37 = vector.shape_cast %36 : vector<8x64xf32> to vector<8x4x16xf32>
    %38 = tpu.transpose %33, [1, 0, 2] : vector<8x4x16xf32> -> vector<4x8x16xf32>
    %c0_14 = arith.constant 0 : index
    %c0_15 = arith.constant 0 : index
    %c0_16 = arith.constant 0 : index
    %c0_17 = arith.constant 0 : index
    %39 = vector.load %arg6[%c0_14, %c0_15, %c0_16, %c0_17] : memref<1x4x8x16xf32, #tpu.memory_space<vmem>>, vector<1x4x8x16xf32>
    %40 = vector.shape_cast %39 : vector<1x4x8x16xf32> to vector<4x8x16xf32>
    %41 = vector.shape_cast %38 : vector<4x8x16xf32> to vector<1x4x8x16xf32>
    tpu.vector_store %arg6[%c0_14, %c0_15, %c0_16, %c0_17], %41 {strides = array<i32>} : memref<1x4x8x16xf32, #tpu.memory_space<vmem>>, vector<1x4x8x16xf32>,
    %42 = tpu.transpose %35, [1, 0, 2] : vector<8x4x16xf32> -> vector<4x8x16xf32>
    %c0_18 = arith.constant 0 : index
    %c0_19 = arith.constant 0 : index
    %c0_20 = arith.constant 0 : index
    %c0_21 = arith.constant 0 : index
    %43 = vector.load %arg7[%c0_18, %c0_19, %c0_20, %c0_21] : memref<1x4x8x16xf32, #tpu.memory_space<vmem>>, vector<1x4x8x16xf32>
    %44 = vector.shape_cast %43 : vector<1x4x8x16xf32> to vector<4x8x16xf32>
    %45 = vector.shape_cast %42 : vector<4x8x16xf32> to vector<1x4x8x16xf32>
    tpu.vector_store %arg7[%c0_18, %c0_19, %c0_20, %c0_21], %45 {strides = array<i32>} : memref<1x4x8x16xf32, #tpu.memory_space<vmem>>, vector<1x4x8x16xf32>,
    %46 = tpu.transpose %37, [1, 0, 2] : vector<8x4x16xf32> -> vector<4x8x16xf32>
    %c0_22 = arith.constant 0 : index
    %c0_23 = arith.constant 0 : index
    %c0_24 = arith.constant 0 : index
    %c0_25 = arith.constant 0 : index
    %47 = vector.load %arg8[%c0_22, %c0_23, %c0_24, %c0_25] : memref<1x4x8x16xf32, #tpu.memory_space<vmem>>, vector<1x4x8x16xf32>
    %48 = vector.shape_cast %47 : vector<1x4x8x16xf32> to vector<4x8x16xf32>
    %49 = vector.shape_cast %46 : vector<4x8x16xf32> to vector<1x4x8x16xf32>
    tpu.vector_store %arg8[%c0_22, %c0_23, %c0_24, %c0_25], %49 {strides = array<i32>} : memref<1x4x8x16xf32, #tpu.memory_space<vmem>>, vector<1x4x8x16xf32>,
    return
  }
  func.func @transform_0(%arg0: i32, %arg1: i32) -> (i32, i32, i32) {
    %c0_i32 = arith.constant 0 : i32
    %c0_i32_0 = arith.constant 0 : i32
    return %arg0, %arg1, %c0_i32 : i32, i32, i32
  }
  func.func @transform_1(%arg0: i32, %arg1: i32) -> (i32, i32) {
    %c0_i32 = arith.constant 0 : i32
    %c0_i32_0 = arith.constant 0 : i32
    %c0_i32_1 = arith.constant 0 : i32
    return %c0_i32, %c0_i32_0 : i32, i32
  }
  func.func @transform_2(%arg0: i32, %arg1: i32) -> (i32, i32) {
    %c0_i32 = arith.constant 0 : i32
    %c0_i32_0 = arith.constant 0 : i32
    %c0_i32_1 = arith.constant 0 : i32
    return %c0_i32, %c0_i32_0 : i32, i32
  }
  func.func @transform_3(%arg0: i32, %arg1: i32) -> (i32, i32) {
    %c0_i32 = arith.constant 0 : i32
    %c0_i32_0 = arith.constant 0 : i32
    %c0_i32_1 = arith.constant 0 : i32
    return %c0_i32, %c0_i32_0 : i32, i32
  }
  func.func @transform_4(%arg0: i32, %arg1: i32) -> (i32, i32, i32, i32) {
    %c0_i32 = arith.constant 0 : i32
    %c0_i32_0 = arith.constant 0 : i32
    %c0_i32_1 = arith.constant 0 : i32
    return %arg0, %c0_i32, %arg1, %c0_i32_0 : i32, i32, i32, i32
  }
  func.func @transform_5(%arg0: i32, %arg1: i32) -> (i32, i32, i32, i32) {
    %c0_i32 = arith.constant 0 : i32
    %c0_i32_0 = arith.constant 0 : i32
    %c0_i32_1 = arith.constant 0 : i32
    return %arg0, %c0_i32, %arg1, %c0_i32_0 : i32, i32, i32, i32
  }
  func.func @transform_6(%arg0: i32, %arg1: i32) -> (i32, i32, i32, i32) {
    %c0_i32 = arith.constant 0 : i32
    %c0_i32_0 = arith.constant 0 : i32
    %c0_i32_1 = arith.constant 0 : i32
    return %arg0, %c0_i32, %arg1, %c0_i32_0 : i32, i32, i32, i32
  }
}

</mosaic_0001>

<bundles_post_ra>
// kernel: tpu_custom_call.1
= control target key start
LH: loop header
LB: loop body
LE: loop exit
PB: predicated region body
PF: predicated region fallthrough
CT: control target
= control target key end

     0   :  { %s1904_s0 = inlined_call_operand.hbm [shape: f32[2,8,32], index: 0, kind: input, shape index: {}]   ;;  %s1905_s1 = inlined_call_operand.vmem [shape: f32[1,32], index: 1, kind: input, shape index: {}]   ;;  %s1906_s2 = inlined_call_operand.vmem [shape: f32[1,32], index: 2, kind: input, shape index: {}]   ;;  %s1907_s3 = inlined_call_operand.hbm [shape: f32[32,192], index: 3, kind: input, shape index: {}]   ;;  %s1908_s4 = inlined_call_operand.hbm [shape: f32[2,4,8,16], index: 4, kind: output, shape index: {0}]   ;;  %s1909_s5 = inlined_call_operand.hbm [shape: f32[2,4,8,16], index: 5, kind: output, shape index: {1}]   ;;  %s1910_s6 = inlined_call_operand.hbm [shape: f32[2,4,8,16], index: 6, kind: output, shape index: {2}]  }
   0x1   :  { %1915 = sst [smem:[#allocation15_spill]] %s1907_s3 }
   0x2   :  { %12 = vsyncpa [#allocation3], 0 }
   0x3   :  { %14 = vsyncpa [#allocation3 + $0x1], 0 }
   0x4   :  { %15 = vsyncpa [#allocation6], 0 }
   0x5   :  { %16 = vsyncpa [#allocation4], 0 }
   0x6   :  { %18 = vsyncpa [#allocation4 + $0x1], 0 }
   0x7   :  { %19 = vsyncpa [#allocation9], 0 }
   0x8   :  { %21 = vsyncpa [#allocation9 + $0x1], 0  ;;  %s1509_s21 = smov 0   ;;  %s1511_s22 = smov 0  }
   0x9   :  { %s1513_s23 = smov 0   ;;  %s1515_s24 = smov 0  }
   0xa   :  { %s1517_s25 = smov 0   ;;  %s1519_s26 = smov 0  }
   0xb LB: > { %s1540_s27 = sadd.s32 4294967295, %s1456_s26   ;;  %s1914_s28 = sadd.s32 4294967294, %s1456_s26   ;;  %s1456_s26 = sphi %s1519_s26, %s27_s26   ;;  %s1452_s25 = sphi %s1517_s25, %s1936_s25   ;;  %s1448_s24 = sphi %s1515_s24, %s1935_s24   ;;  %s1444_s23 = sphi %s1513_s23, %s1934_s23   ;;  %s1440_s22 = sphi %s1511_s22, %s1933_s22   ;;  %s1436_s21 = sphi %s1509_s21, %s1932_s21  }
   0xc   : > { %p61_p0 = scmp.ne.s32.totalorder %s1440_s22, %s1436_s21  ;;  %p1911_p1 = scmp.eq.s32.totalorder %s1540_s27, 0 }
   0xd   : > { %p156_p3 = scmp.eq.s32.totalorder %s1914_s28, 1  ;;  %p1116_p5 = scmp.ge.s32.totalorder %s1456_s26, 1 }
   0xe   : > { %p1551_p4 = por %p1911_p1, %p61_p0  ;;  %p219_p7 = scmp.lt.s32.totalorder %s1456_s26, 3 }
   0xf   : > { %p1556_p6 = por %p156_p3, %p61_p0  ;;  %s1458_s8 = smov [#allocation5]  }
  0x10   : > { %s1916_s29 = scalar_select %p1551_p4, 1, 0 }
  0x11   : > { %s1917_s30 = scalar_select %p1556_p6, 1, 0 }
  0x12   : > { %p1561_p8 = pnand %p1116_p5, %p219_p7  ;;  %s237_s9 = sshll.u32 %s1458_s8, 4  ;;  %s238_s9 = int_to_ptr.vmem [resolvable:$true] %s237_s9 }
  0x13   : > { %s39_s11 = sadd.s32 1, %s1452_s25  ;;  %s1920_s3 = sld [smem:[#allocation15_spill]] }
  0x14   : > { %s1918_s7 = scalar_select %p1561_p8, 1, 0 }
  0x15   : > { %p1168_p9 = pneg %p1561_p8 }
  0x17   : > { %p1570_p11 = pnand %p1168_p9, %p1911_p1 }
  0x19   : > { %s1252_s14 = scalar_lea.hbm %s1920_s3, 1024  ;;  %p1254_p13 = pneg %p1570_p11 }
  0x1a   : > { %p1253_p12 = scmp.ne.s32.totalorder %s1920_s3, %s1252_s14  ;;  %p1259_p5 = scmp.lt.u32.totalorder %s1252_s14, %s1920_s3 }
  0x1c   : > { %p1255_p0 = pnand %p1254_p13, %p1253_p12 }
  0x1e   : > { %p1256_p3 = pneg %p1255_p0 }
  0x20   : > { %p1261_p7 = pnand %p1259_p5, %p1256_p3 }
  0x22   : > { %1264 = shalt.err (!%p1261_p7)
}
  0x23   : > { %s1265_s19 = scalar_lea.vmem %s238_s9, 1024  ;;  %p1273_p2 = scmp.lt.s32.totalorder %s238_s9, %s238_s9 }
  0x24   : > { %p1266_p9 = scmp.ne.s32.totalorder %s238_s9, %s1265_s19  ;;  %p1274_p6 = scmp.lt.s32.totalorder %s1265_s19, %s1265_s19 }
  0x26   : > { %p1268_p10 = pnand %p1266_p9, %p1254_p13  ;;  %p1275_p4 = por %p1274_p6, %p1273_p2 }
  0x28   : > { %p1269_p1 = pneg %p1268_p10 }
  0x2a   : > { %p1276_p8 = pnand %p1275_p4, %p1269_p1 }
  0x2c   : > { %1279 = shalt.err (!%p1276_p8)
}
  0x2d   : > { %s1459_s20 = smov 256   ;;  %s1460_s8 = smov 16  }
  0x2e   : > { %1171 = dma.hbm_to_vmem [thread:$0]  (!%p1570_p11), %s1920_s3, 1024, %s238_s9, [#allocation6], %s1459_s20, %s1459_s20, %s1460_s8  }
  0x2f   : > { %p41_p1 = scmp.ge.s32.totalorder %s39_s11, 2  ;;  %s48_s14 = sadd.s32 1, %s1444_s23 }
  0x30   : > { %p55_p2 = scmp.ne.s32.totalorder %s1444_s23, %s1440_s22  ;;  %p56_p4 = scmp.eq.s32.totalorder %s1456_s26, 0 }
  0x31   : > { %s1938_s11 = smov (%p41_p1, %s39_s11), 0  ;;  %p1922_p8 = scmp.eq.s32.totalorder %s1540_s27, 1 }
  0x32   : > { %p1597_p6 = por %p56_p4, %p55_p2  ;;  %s43_s10 = ssub.s32 %s1452_s25, %s1938_s11 }
  0x33   : > { %p1603_p10 = por %p1922_p8, %p55_p2  ;;  %p1187_p12 = scmp.lt.s32.totalorder %s1456_s26, 2 }
  0x34   : > { %p46_p11 = scmp.eq.s32.totalorder %s43_s10, 0  ;;  %s251_s9 = sand.u32 1, %s1444_s23  }
  0x35   : > { %s1119_s17 = sshll.u32 %s251_s9, 3  ;;  %s1120_s19 = sshll.u32 %s1452_s25, 7 }
  0x36   : > { %s1612_s18 = scalar_select %p46_p11, %s1444_s23, %s48_s14  }
  0x37   : > { %s1618_s12 = scalar_lea.hbm %s1904_s0, %s1120_s19  ;;  %s255_s13 = scalar_lea.vmem [#allocation2], %s1119_s17 }
  0x38   : > { %s263_s28 = sshll.u32 %s255_s13, 4  ;;  %p1624_p13 = pnand %p1187_p12, %p1597_p6  ;;  %s1620_s28 = int_to_ptr.vmem [resolvable:$true] %s263_s28 }
  0x39   : > { %s252_s14 = scalar_lea.sflag [#allocation3], %s251_s9  ;;  %s1280_s3 = scalar_lea.hbm %s1618_s12, 128 }
  0x3a   : > { %p1281_p0 = scmp.ne.s32.totalorder %s1618_s12, %s1280_s3  ;;  %p1282_p3 = pneg %p1624_p13 }
  0x3b   : > { %s1285_s20 = scalar_lea.hbm %s1904_s0, 256  ;;  %p1286_p9 = scmp.lt.u32.totalorder %s1618_s12, %s1904_s0 }
  0x3c   : > { %p1283_p5 = pnand %p1282_p3, %p1281_p0  ;;  %p1287_p1 = scmp.lt.u32.totalorder %s1285_s20, %s1280_s3 }
  0x3d   : > { %p1289_p4 = scmp.lt.u32.totalorder %s1280_s3, %s1618_s12 }
  0x3e   : > { %p1284_p7 = pneg %p1283_p5  ;;  %p1288_p2 = por %p1287_p1, %p1286_p9 }
  0x40   : > { %p1290_p6 = por %p1289_p4, %p1288_p2 }
  0x42   : > { %p1291_p8 = pnand %p1290_p6, %p1284_p7 }
  0x44   : > { %1294 = shalt.err (!%p1291_p8)
}
  0x45   : > { %s1295_s9 = scalar_lea.vmem %s1620_s28, 128  ;;  %s1461_s13 = smov [#allocation2]  }
  0x46   : > { %p1296_p12 = scmp.ne.s32.totalorder %s1620_s28, %s1295_s9  ;;  %s1300_s17 = sshll.u32 %s1461_s13, 4  ;;  %s1301_s17 = int_to_ptr.vmem [resolvable:$false] %s1300_s17 }
  0x47   : > { %s1302_s19 = scalar_lea.vmem %s1301_s17, 256  ;;  %p1303_p5 = scmp.lt.s32.totalorder %s1620_s28, %s1301_s17 }
  0x48   : > { %p1298_p11 = pnand %p1296_p12, %p1282_p3  ;;  %p1304_p9 = scmp.lt.s32.totalorder %s1302_s19, %s1295_s9 }
  0x4a   : > { %p1299_p0 = pneg %p1298_p11  ;;  %p1305_p1 = por %p1304_p9, %p1303_p5 }
  0x4c   : > { %p1306_p2 = pnand %p1305_p1, %p1299_p0 }
  0x4e   : > { %1309 = shalt.err (!%p1306_p2)
}
  0x4f   : > { %1175 = dma.hbm_to_vmem [thread:$0]  (!%p1624_p13), %s1618_s12, 128, %s1620_s28, %s252_s14  }
  0x50   : > { %p1925_p7 = scmp.ne.s32.totalorder %s1918_s7, 0 }
  0x51   : > { %s1656_s3 = sand.u32 (!%p1925_p7), 1, %s1440_s22   ;;  %p1926_p3 = scmp.ne.s32.totalorder (!%p1925_p7), %s1916_s29, 0 }
  0x52   : > { %272 = sbr.rel (%p1925_p7) target bundleno = 919 (0x397), region = 36  ;;  %s1122_s20 = sshll.u32 (!%p1925_p7), %s1656_s3, 3 }
  0x53   : > { %s275_s15 = scalar_lea.sflag (!%p1925_p7), [#allocation3], %s1656_s3  ;;  %s278_s8 = scalar_lea.vmem (!%p1925_p7), [#allocation2], %s1122_s20 }
  0x59   : > { %1419 = dma.done.wait (%p1926_p3), %s275_s15, 128  }
  0x5a   : > { %1421 = vsyncadd (%p1926_p3), %s275_s15, 4294967168  ;;  %p1927_p4 = scmp.eq.s32.totalorder %s1540_s27, 0 }
  0x5c   : > { %1423 = dma.done.wait (%p1927_p4), [#allocation6], 1024   ;;  %p1928_p13 = pmov %p1927_p4 }
  0x5d   : > { %vm324_vm0 = vcmask 261120   ;;  %v321_v0 = vld [vmem:[%s278_s8] sm:$0xff]  ;;  %v354_v7 = vld [vmem:[#allocation5 + $0x8] sm:$0xff]  ;;  %v353_v9 = vld [vmem:[#allocation5] sm:$0xff]  ;;  %v1462_v14 = vmov 0.0   ;;  %s1463_s10 = smov 80   ;;  %v450_v33 = vlaneseq }
  0x5e   : > { %1425 = vsyncadd (%p1928_p13), [#allocation6], 4294966272  ;;  %v325_v1 = vsel %vm324_vm0, %v321_v0, 0.0  ;;  %v356_v8 = vld [vmem:[#allocation5 + $0x18] sm:$0xff]  ;;  %v355_v11 = vld [vmem:[#allocation5 + $0x10] sm:$0xff]  ;;  %428 = vmatprep.mubr.f32.mxu0 %v1462_v14  ;;  %s1464_s14 = smov 112  }
  0x5f   : > { %326 = vadd.xlane.f32.xlu0 %v325_v1  ;;  %v1148_v10 = vpack.c.bf16 %v356_v8, %v354_v7  ;;  %v358_v12 = vld [vmem:[#allocation5 + $0x28] sm:$0xff]  ;;  %v360_v13 = vld [vmem:[#allocation5 + $0x38] sm:$0xff]  ;;  %v1150_v15 = vpack.c.bf16 %v355_v11, %v353_v9  ;;  %v357_v17 = vld [vmem:[#allocation5 + $0x20] sm:$0xff]  ;;  %s1465_s9 = smov 96   ;;  %s1466_s13 = smov 64   ;;  %v451_v37 = vshrl.u32 %v450_v33, 7 }
  0x60   : > { %v1152_v16 = vpack.c.bf16 %v360_v13, %v358_v12  ;;  %v359_v18 = vld [vmem:[#allocation5 + $0x30] sm:$0xff]  ;;  %v1467_v31 = vmov 1983009808   ;;  %v1468_v34 = vmov 1934713408   ;;  %s1706_s17 = sshll.u32 %s1656_s3, 5 }
  0x61   : > { %1149 = vmatprep.subr.bf16.mxu0 %v1148_v10  ;;  %v1154_v19 = vpack.c.bf16 %v359_v18, %v357_v17  ;;  %v1127_v24 = vld [vmem:[%s1905_s1] ss:$0 sm:$0xff]  ;;  %v448_v32 = vunpack.c.l.s4 %v1467_v31  ;;  %v480_v35 = vunpack.c.l.s4 %v1468_v34  ;;  %s1709_s19 = sshll.u32 %s1448_s24, 9  ;;  %vm747_vm1 = vcmask 130048   ;;  %s306_s20 = scalar_lea.vmem [#allocation7], %s1706_s17 }
  0x62   : > { %1151 = vmatpush1.bf16.msra.mxu0 %v1150_v15  ;;  %v1128_v26 = vld [vmem:[%s1906_s2] ss:$0 sm:$0xff]  ;;  %s921_s15 = sshll.u32 %s306_s20, 4  ;;  %s1720_s28 = scalar_lea.hbm %s1908_s4, %s1709_s19  ;;  %s1722_s15 = int_to_ptr.vmem [resolvable:$true] %s921_s15 }
  0x63   : > { %1153 = vmatprep.subr.bf16.mxu0 %v1152_v16  ;;  %v449_v36 = vunpack.c.0.s8 %v448_v32  ;;  %v481_v40 = vunpack.c.0.s8 %v480_v35  ;;  %s897_s29 = scalar_lea.sflag [#allocation4], %s1656_s3  ;;  %s1310_s7 = scalar_lea.vmem %s1722_s15, 512 }
  0x64   : > { %p1311_p6 = scmp.ne.s32.totalorder %s1722_s15, %s1310_s7  ;;  %s1469_s12 = smov [#allocation7]  }
  0x65   : > { %v1683_v41 = vsub.s32 %v449_v36, %v451_v37  ;;  %v1685_v47 = vsub.s32 %v481_v40, %v451_v37 }
  0x66   : > { %1155 = vmatpush1.bf16.msra.mxu0 %v1154_v19  ;;  %p1312_p8 = pnand %p1311_p6, %p1603_p10 }
  0x68   : > { %p1313_p12 = pneg %p1312_p8 }
  0xec   : > { %v327_v2 = vpop.xlane.xlu0 %326 }
  0xed   : > { %v329_v3 = vmul.f32 0.03125, %v327_v2 }
  0xef   : > { %v330_v4 = vsub.f32 %v321_v0, %v329_v3 }
  0xf1   : > { %v331_v5 = vmul.f32 %v330_v4, %v330_v4 }
  0xf3   : > { %v332_v6 = vsel %vm324_vm0, %v331_v5, 0.0 }
  0xf4   : > { %333 = vadd.xlane.f32.xlu0 %v332_v6 }
 0x181   : > { %v334_v20 = vpop.xlane.xlu0 %333 }
 0x182   : > { %v335_v21 = vmul.f32 0.03125, %v334_v20 }
 0x184   : > { %v336_v22 = vadd.f32 1e-05, %v335_v21 }
 0x186   : > { %1250 = vrsqrt.f32 %v336_v22 }
 0x190   : > { %v1251_v23 = vpop.eup %1250 }
 0x191   : > { %v338_v25 = vmul.f32 %v1251_v23, %v330_v4 }
 0x193   : > { %v345_v27 = vmul.f32 %v1127_v24, %v338_v25 }
 0x195   : > { %v352_v28 = vadd.f32 %v1128_v26, %v345_v27 }
 0x197   : > { %1129 = vmatmul.mubr.msk.f32.vlgmr.msra.gmra.mrb[0].mxu0 %vm324_vm0, %v352_v28 }
 0x26a   : > { %v430_v29 = vpop.f32.mrb[0].mxu0 }
 0x26b   : > { %442 = vrot.lane.b32.xlu0 %v430_v29, %s1463_s10  ;;  %436 = vrot.lane.b32.xlu1 %v430_v29, %s1464_s14  ;;  %v1678_v30 = vpop.f32.mrb[1].mxu0 }
 0x26f   : > { %439 = vrot.lane.b32.xlu1 %v430_v29, %s1465_s9  ;;  %608 = vrot.lane.b32.xlu0 %v1678_v30, %s1463_s10  ;;  %s1314_s10 = sshll.u32 %s1469_s12, 4  ;;  %s1315_s10 = int_to_ptr.vmem [resolvable:$false] %s1314_s10 }
 0x270   : > { %p1317_p11 = scmp.lt.s32.totalorder %s1722_s15, %s1315_s10 }
 0x273   : > { %521 = vrot.lane.b32.xlu1 %v430_v29, %s1466_s13 }
 0x277   : > { %602 = vrot.lane.b32.xlu1 %v1678_v30, %s1464_s14  ;;  %s1316_s14 = scalar_lea.vmem %s1315_s10, 1024 }
 0x278   : > { %p1318_p0 = scmp.lt.s32.totalorder %s1316_s14, %s1310_s7 }
 0x27a   : > { %p1319_p5 = por %p1318_p0, %p1317_p11 }
 0x27c   : > { %p1320_p9 = pnand %p1319_p5, %p1313_p12 }
 0x2dd   : > { %v443_v38 = vpop.permute.xlu0 %442  ;;  %v437_v39 = vpop.permute.xlu1 %436 }
 0x2de   : > { %523 = vrot.lane.b32.xlu1 %v437_v39, %s1466_s13  ;;  %v461_v42 = vcombine.low %v437_v39, %v443_v38  ;;  %v462_v43 = vcombine.high %v437_v39, %v443_v38 }
 0x2e0   : > { %v469_v48 = vrot.slane %v461_v42, %v1683_v41  ;;  %v476_v49 = vrot.slane %v462_v43, %v1683_v41 }
 0x2e1   : > { %v440_v44 = vpop.permute.xlu1 %439 }
 0x2e2   : > { %v445_v45 = vcombine.low %v430_v29, %v440_v44  ;;  %v446_v46 = vcombine.high %v430_v29, %v440_v44  ;;  %525 = vrot.lane.b32.xlu1 %v440_v44, %s1466_s13 }
 0x2e4   : > { %v453_v50 = vrot.slane %v445_v45, %v1683_v41  ;;  %v460_v51 = vrot.slane %v446_v46, %v1683_v41 }
 0x2e6   : > { %v477_v52 = vcombine.low %v453_v50, %v469_v48  ;;  %v478_v53 = vcombine.high %v453_v50, %v469_v48  ;;  %v493_v54 = vcombine.low %v460_v51, %v476_v49  ;;  %v494_v55 = vcombine.high %v460_v51, %v476_v49  ;;  %527 = vrot.lane.b32.xlu1 %v443_v38, %s1466_s13 }
 0x2e8   : > { %v485_v56 = vrot.slane %v477_v52, %v1685_v47  ;;  %v492_v57 = vrot.slane %v478_v53, %v1685_v47  ;;  %v501_v58 = vrot.slane %v493_v54, %v1685_v47  ;;  %v508_v59 = vrot.slane %v494_v55, %v1685_v47 }
 0x2ea   : > { %v509_v60 = vcombine.high %v485_v56, %v1462_v14  ;;  %v510_v61 = vcombine.high %v492_v57, %v1462_v14  ;;  %v511_v62 = vcombine.high %v501_v58, %v1462_v14  ;;  %v512_v63 = vcombine.high %v508_v59, %v1462_v14  ;;  %605 = vrot.lane.b32.xlu1 %v1678_v30, %s1465_s9 }
 0x2eb   : > { %v513_v0 = vmul.f32 0.25, %v485_v56  ;;  %v515_v1 = vmul.f32 0.25, %v492_v57  ;;  %v517_v2 = vmul.f32 0.25, %v501_v58  ;;  %v519_v3 = vmul.f32 0.25, %v508_v59 }
 0x2ec   : > { %v514_v4 = vmul.f32 0.25, %v509_v60  ;;  %v516_v5 = vmul.f32 0.25, %v510_v61  ;;  %v518_v6 = vmul.f32 0.25, %v511_v62  ;;  %v520_v7 = vmul.f32 0.25, %v512_v63 }
 0x2ed   : > { %v679_v8 = vcombine.low %v513_v0, %v515_v1  ;;  %v695_v9 = vcombine.low %v517_v2, %v519_v3 }
 0x2ee   : > { %v687_v10 = vcombine.low %v514_v4, %v516_v5  ;;  %v703_v11 = vcombine.low %v518_v6, %v520_v7 }
 0x2ef   : > { %v686_v12 = vrot.slane %v679_v8, %v1683_v41  ;;  %v702_v14 = vrot.slane %v695_v9, %v1683_v41 }
 0x2f0   : > { %v694_v13 = vrot.slane %v687_v10, %v1683_v41  ;;  %v710_v15 = vrot.slane %v703_v11, %v1683_v41 }
 0x2f2   : > { %v711_v16 = vcombine.low %v686_v12, %v694_v13  ;;  %v712_v17 = vcombine.high %v686_v12, %v694_v13  ;;  %v727_v18 = vcombine.low %v702_v14, %v710_v15  ;;  %v728_v19 = vcombine.high %v702_v14, %v710_v15 }
 0x2f4   : > { %v719_v20 = vrot.slane %v711_v16, %v1685_v47  ;;  %v726_v21 = vrot.slane %v712_v17, %v1685_v47  ;;  %v735_v22 = vrot.slane %v727_v18, %v1685_v47  ;;  %v742_v23 = vrot.slane %v728_v19, %v1685_v47 }
 0x2f6   : > { %v743_v24 = vcombine.low %v719_v20, %v735_v22  ;;  %v744_v25 = vcombine.high %v719_v20, %v735_v22  ;;  %v745_v26 = vcombine.low %v726_v21, %v742_v23  ;;  %v746_v27 = vcombine.high %v726_v21, %v742_v23 }
 0x2f8   : > { %748 = vst.msk [vmem:[%s306_s20] sm:$0xff] %vm747_vm1, %v743_v24  ;;  %749 = vst.msk [vmem:[%s306_s20 + $0x8] sm:$0xff] %vm747_vm1, %v744_v25 }
 0x2f9   : > { %750 = vst.msk [vmem:[%s306_s20 + $0x10] sm:$0xff] %vm747_vm1, %v745_v26  ;;  %751 = vst.msk [vmem:[%s306_s20 + $0x18] sm:$0xff] %vm747_vm1, %v746_v27 }
 0x2fa   : > { %1323 = shalt.err (!%p1320_p9)
}
 0x2fb   : > { %s1324_s9 = scalar_lea.hbm %s1720_s28, 512  ;;  %s1328_s24 = scalar_lea.hbm %s1908_s4, 1024 }
 0x2fc   : > { %p1325_p1 = scmp.ne.s32.totalorder %s1720_s28, %s1324_s9  ;;  %p1329_p3 = scmp.lt.u32.totalorder %s1720_s28, %s1908_s4 }
 0x2fd   : > { %p1330_p4 = scmp.lt.u32.totalorder %s1328_s24, %s1324_s9  ;;  %p1332_p6 = scmp.lt.u32.totalorder %s1324_s9, %s1720_s28 }
 0x2fe   : > { %p1326_p2 = pnand %p1325_p1, %p1603_p10 }
 0x2ff   : > { %p1331_p13 = por %p1330_p4, %p1329_p3 }
 0x300   : > { %p1327_p7 = pneg %p1326_p2 }
 0x301   : > { %p1333_p8 = por %p1332_p6, %p1331_p13 }
 0x303   : > { %p1334_p12 = pnand %p1333_p8, %p1327_p7 }
 0x305   : > { %1337 = shalt.err (!%p1334_p12)
}
 0x306   : > { %s1470_s7 = smov 128   ;;  %s1471_s10 = smov 8   ;;  %v522_v28 = vpop.permute.xlu1 %521  ;;  %v609_v38 = vpop.permute.xlu0 %608 }
 0x307   : > { %1162 = dma.vmem_to_hbm [thread:$0]  (%p1603_p10), %s1722_s15, 512, %s1720_s28, %s897_s29, %s1470_s7, %s1470_s7, %s1471_s10  }
 0x308   : > { %s901_s3 = sand.u32 1, %s1540_s27   ;;  %s313_s15 = scalar_lea.vmem [#allocation8], %s1706_s17 }
 0x309   : > { %s938_s28 = sshll.u32 %s313_s15, 4  ;;  %s1791_s9 = scalar_lea.hbm %s1909_s5, %s1709_s19  ;;  %s1793_s28 = int_to_ptr.vmem [resolvable:$true] %s938_s28 }
 0x30a   : > { %v603_v29 = vpop.permute.xlu1 %602  ;;  %s1800_s13 = scalar_lea.vmem [#allocation10], %s1706_s17  ;;  %s1809_s24 = scalar_lea.sflag [#allocation9], %s901_s3 }
 0x30b   : > { %v627_v44 = vcombine.low %v603_v29, %v609_v38  ;;  %v628_v45 = vcombine.high %v603_v29, %v609_v38  ;;  %s955_s20 = sshll.u32 %s1800_s13, 4  ;;  %s1338_s8 = scalar_lea.vmem %s1793_s28, 512  ;;  %s1844_s20 = int_to_ptr.vmem [resolvable:$true] %s955_s20 }
 0x30c   : > { %p1339_p11 = scmp.ne.s32.totalorder %s1793_s28, %s1338_s8  ;;  %s1472_s17 = smov [#allocation8]  }
 0x30d   : > { %v635_v58 = vrot.slane %v627_v44, %v1683_v41  ;;  %v642_v59 = vrot.slane %v628_v45, %v1683_v41  ;;  %s1342_s12 = sshll.u32 %s1472_s17, 4  ;;  %s1343_s12 = int_to_ptr.vmem [resolvable:$false] %s1342_s12 }
 0x30e   : > { %p1340_p0 = pnand %p1339_p11, %p1603_p10  ;;  %p1345_p9 = scmp.lt.s32.totalorder %s1793_s28, %s1343_s12 }
 0x310   : > { %p1341_p5 = pneg %p1340_p0 }
 0x350   : > { %v524_v31 = vpop.permute.xlu1 %523 }
 0x354   : > { %v526_v32 = vpop.permute.xlu1 %525 }
 0x355   : > { %v533_v33 = vcombine.low %v522_v28, %v526_v32  ;;  %v534_v34 = vcombine.high %v522_v28, %v526_v32 }
 0x357   : > { %v541_v39 = vrot.slane %v533_v33, %v1683_v41  ;;  %v548_v40 = vrot.slane %v534_v34, %v1683_v41 }
 0x358   : > { %v528_v35 = vpop.permute.xlu1 %527 }
 0x359   : > { %v549_v36 = vcombine.low %v524_v31, %v528_v35  ;;  %v550_v37 = vcombine.high %v524_v31, %v528_v35 }
 0x35b   : > { %v557_v42 = vrot.slane %v549_v36, %v1683_v41  ;;  %v564_v43 = vrot.slane %v550_v37, %v1683_v41 }
 0x35c   : > { %v606_v46 = vpop.permute.xlu1 %605 }
 0x35d   : > { %v565_v48 = vcombine.low %v541_v39, %v557_v42  ;;  %v566_v49 = vcombine.high %v541_v39, %v557_v42  ;;  %v581_v50 = vcombine.low %v548_v40, %v564_v43  ;;  %v582_v51 = vcombine.high %v548_v40, %v564_v43 }
 0x35e   : > { %v611_v52 = vcombine.low %v1678_v30, %v606_v46  ;;  %v612_v53 = vcombine.high %v1678_v30, %v606_v46 }
 0x35f   : > { %v573_v54 = vrot.slane %v565_v48, %v1685_v47  ;;  %v580_v55 = vrot.slane %v566_v49, %v1685_v47  ;;  %v589_v56 = vrot.slane %v581_v50, %v1685_v47  ;;  %v596_v57 = vrot.slane %v582_v51, %v1685_v47 }
 0x360   : > { %v619_v60 = vrot.slane %v611_v52, %v1683_v41  ;;  %v626_v61 = vrot.slane %v612_v53, %v1683_v41 }
 0x361   : > { %v752_v62 = vcombine.low %v573_v54, %v580_v55  ;;  %v1130_v63 = vcombine.high %v573_v54, %v580_v55  ;;  %v768_v0 = vcombine.low %v589_v56, %v596_v57  ;;  %v1131_v30 = vcombine.high %v589_v56, %v596_v57 }
 0x362   : > { %v643_v1 = vcombine.low %v619_v60, %v635_v58  ;;  %v644_v2 = vcombine.high %v619_v60, %v635_v58  ;;  %v659_v3 = vcombine.low %v626_v61, %v642_v59  ;;  %v660_v4 = vcombine.high %v626_v61, %v642_v59 }
 0x363   : > { %v759_v5 = vrot.slane %v752_v62, %v1683_v41  ;;  %v767_v6 = vrot.slane %v1130_v63, %v1683_v41  ;;  %v775_v7 = vrot.slane %v768_v0, %v1683_v41  ;;  %v783_v8 = vrot.slane %v1131_v30, %v1683_v41 }
 0x364   : > { %v651_v9 = vrot.slane %v643_v1, %v1685_v47  ;;  %v658_v10 = vrot.slane %v644_v2, %v1685_v47  ;;  %v667_v11 = vrot.slane %v659_v3, %v1685_v47  ;;  %v674_v12 = vrot.slane %v660_v4, %v1685_v47 }
 0x365   : > { %v784_v13 = vcombine.low %v759_v5, %v767_v6  ;;  %v785_v14 = vcombine.high %v759_v5, %v767_v6  ;;  %v800_v15 = vcombine.low %v775_v7, %v783_v8  ;;  %v801_v16 = vcombine.high %v775_v7, %v783_v8 }
 0x366   : > { %v824_v17 = vcombine.low %v651_v9, %v658_v10  ;;  %v1132_v18 = vcombine.high %v651_v9, %v658_v10  ;;  %v840_v19 = vcombine.low %v667_v11, %v674_v12  ;;  %v1133_v20 = vcombine.high %v667_v11, %v674_v12 }
 0x367   : > { %v792_v21 = vrot.slane %v784_v13, %v1685_v47  ;;  %v799_v22 = vrot.slane %v785_v14, %v1685_v47  ;;  %v808_v23 = vrot.slane %v800_v15, %v1685_v47  ;;  %v815_v24 = vrot.slane %v801_v16, %v1685_v47 }
 0x368   : > { %v831_v25 = vrot.slane %v824_v17, %v1683_v41  ;;  %v839_v26 = vrot.slane %v1132_v18, %v1683_v41  ;;  %v847_v27 = vrot.slane %v840_v19, %v1683_v41  ;;  %v855_v28 = vrot.slane %v1133_v20, %v1683_v41 }
 0x369   : > { %v816_v29 = vcombine.low %v792_v21, %v808_v23  ;;  %v817_v31 = vcombine.high %v792_v21, %v808_v23  ;;  %v818_v32 = vcombine.low %v799_v22, %v815_v24  ;;  %v819_v33 = vcombine.high %v799_v22, %v815_v24 }
 0x36a   : > { %v856_v34 = vcombine.low %v831_v25, %v839_v26  ;;  %v857_v35 = vcombine.high %v831_v25, %v839_v26  ;;  %v872_v36 = vcombine.low %v847_v27, %v855_v28  ;;  %v873_v37 = vcombine.high %v847_v27, %v855_v28 }
 0x36b   : > { %820 = vst.msk [vmem:[%s313_s15] sm:$0xff] %vm747_vm1, %v816_v29  ;;  %821 = vst.msk [vmem:[%s313_s15 + $0x8] sm:$0xff] %vm747_vm1, %v817_v31 }
 0x36c   : > { %822 = vst.msk [vmem:[%s313_s15 + $0x10] sm:$0xff] %vm747_vm1, %v818_v32  ;;  %823 = vst.msk [vmem:[%s313_s15 + $0x18] sm:$0xff] %vm747_vm1, %v819_v33  ;;  %v864_v41 = vrot.slane %v856_v34, %v1685_v47  ;;  %v871_v38 = vrot.slane %v857_v35, %v1685_v47  ;;  %v880_v39 = vrot.slane %v872_v36, %v1685_v47  ;;  %s1344_s15 = scalar_lea.vmem %s1343_s12, 1024 }
 0x36d   : > { %v887_v40 = vrot.slane %v873_v37, %v1685_v47  ;;  %p1346_p1 = scmp.lt.s32.totalorder %s1344_s15, %s1338_s8 }
 0x36f   : > { %p1347_p2 = por %p1346_p1, %p1345_p9 }
 0x371   : > { %p1348_p7 = pnand %p1347_p2, %p1341_p5 }
 0x373   : > { %1351 = shalt.err (!%p1348_p7)
}
 0x374   : > { %s1352_s27 = scalar_lea.hbm %s1791_s9, 512  ;;  %s1356_s14 = scalar_lea.hbm %s1909_s5, 1024 }
 0x375   : > { %p1353_p3 = scmp.ne.s32.totalorder %s1791_s9, %s1352_s27  ;;  %p1357_p6 = scmp.lt.u32.totalorder %s1791_s9, %s1909_s5 }
 0x376   : > { %p1358_p8 = scmp.lt.u32.totalorder %s1356_s14, %s1352_s27  ;;  %p1360_p11 = scmp.lt.u32.totalorder %s1352_s27, %s1791_s9 }
 0x377   : > { %p1354_p4 = pnand %p1353_p3, %p1603_p10 }
 0x378   : > { %p1359_p12 = por %p1358_p8, %p1357_p6 }
 0x379   : > { %p1355_p13 = pneg %p1354_p4 }
 0x37a   : > { %p1361_p0 = por %p1360_p11, %p1359_p12 }
 0x37c   : > { %p1362_p5 = pnand %p1361_p0, %p1355_p13 }
 0x37e   : > { %1365 = shalt.err (!%p1362_p5)
}
 0x37f   : > { %1163 = dma.vmem_to_hbm [thread:$0]  (%p1603_p10), %s1793_s28, 512, %s1791_s9, %s1809_s24, %s1470_s7, %s1470_s7, %s1471_s10   ;;  %v888_v47 = vcombine.low %v864_v41, %v880_v39  ;;  %v889_v42 = vcombine.high %v864_v41, %v880_v39  ;;  %v890_v43 = vcombine.low %v871_v38, %v887_v40  ;;  %v891_v44 = vcombine.high %v871_v38, %v887_v40 }
 0x380   : > { %s1840_s27 = scalar_lea.hbm %s1910_s6, %s1709_s19  ;;  %s1366_s28 = scalar_lea.vmem %s1844_s20, 512 }
 0x381   : > { %892 = vst.msk [vmem:[%s1800_s13] sm:$0xff] %vm747_vm1, %v888_v47  ;;  %893 = vst.msk [vmem:[%s1800_s13 + $0x8] sm:$0xff] %vm747_vm1, %v889_v42  ;;  %p1367_p9 = scmp.ne.s32.totalorder %s1844_s20, %s1366_s28  ;;  %s1473_s19 = smov [#allocation10]  }
 0x382   : > { %894 = vst.msk [vmem:[%s1800_s13 + $0x10] sm:$0xff] %vm747_vm1, %v890_v43  ;;  %895 = vst.msk [vmem:[%s1800_s13 + $0x18] sm:$0xff] %vm747_vm1, %v891_v44  ;;  %s1370_s9 = sshll.u32 %s1473_s19, 4  ;;  %s1371_s9 = int_to_ptr.vmem [resolvable:$false] %s1370_s9 }
 0x383   : > { %p1368_p1 = pnand %p1367_p9, %p1603_p10  ;;  %s1372_s3 = scalar_lea.vmem %s1371_s9, 1024 }
 0x384   : > { %p1373_p7 = scmp.lt.s32.totalorder %s1844_s20, %s1371_s9  ;;  %p1374_p3 = scmp.lt.s32.totalorder %s1372_s3, %s1366_s28 }
 0x385   : > { %p1369_p2 = pneg %p1368_p1 }
 0x386   : > { %p1375_p4 = por %p1374_p3, %p1373_p7 }
 0x388   : > { %p1376_p13 = pnand %p1375_p4, %p1369_p2 }
 0x38a   : > { %1379 = shalt.err (!%p1376_p13)
}
 0x38b   : > { %s1380_s13 = scalar_lea.hbm %s1840_s27, 512  ;;  %s1384_s17 = scalar_lea.hbm %s1910_s6, 1024 }
 0x38c   : > { %p1381_p6 = scmp.ne.s32.totalorder %s1840_s27, %s1380_s13  ;;  %p1385_p11 = scmp.lt.u32.totalorder %s1840_s27, %s1910_s6 }
 0x38d   : > { %p1386_p0 = scmp.lt.u32.totalorder %s1384_s17, %s1380_s13  ;;  %p1388_p9 = scmp.lt.u32.totalorder %s1380_s13, %s1840_s27 }
 0x38e   : > { %p1382_p8 = pnand %p1381_p6, %p1603_p10 }
 0x38f   : > { %p1387_p5 = por %p1386_p0, %p1385_p11 }
 0x390   : > { %p1383_p12 = pneg %p1382_p8 }
 0x391   : > { %p1389_p1 = por %p1388_p9, %p1387_p5 }
 0x393   : > { %p1390_p2 = pnand %p1389_p1, %p1383_p12 }
 0x395   : > { %1393 = shalt.err (!%p1390_p2)
}
 0x396   : > { %1164 = dma.vmem_to_hbm [thread:$0]  (%p1603_p10), %s1844_s20, 512, %s1840_s27, %s1809_s24, %s1470_s7, %s1470_s7, %s1471_s10  }
 0x397 PF: > { %s970_s15 = sand.u32 1, %s1436_s21   ;;  %p1929_p7 = scmp.ne.s32.totalorder %s1917_s30, 0 }
 0x398   : > { %p1930_p3 = scmp.ge.s32.totalorder %s1456_s26, 2  ;;  %s971_s28 = scalar_lea.sflag [#allocation4], %s970_s15 }
 0x39a   : > { %p1177_p4 = pnand %p1930_p3, %p1929_p7 }
 0x39c   : > { %1427 = dma.done.wait (!%p1177_p4), %s971_s28, 512  }
 0x39d   : > { %1429 = vsyncadd (!%p1177_p4), %s971_s28, 4294966784  ;;  %s1931_s16 = sadd.s32 4294967294, %s1456_s26  }
 0x39e   : > { %s979_s19 = sand.u32 1, %s1931_s16  }
 0x39f   : > { %s980_s9 = scalar_lea.sflag [#allocation9], %s979_s19 }
 0x3a0   : > { %1431 = dma.done.wait (!%p1177_p4), %s980_s9, 1024  }
 0x3a1   : > { %1433 = vsyncadd (!%p1177_p4), %s980_s9, 4294966272  ;;  %s27_s26 = sadd.s32 1, %s1456_s26   ;;  %s1932_s21 = smov %s1440_s22 }
 0x3a2   : > { %p24_p10 = scmp.ge.s32.totalorder %s27_s26, 4   ;;  %s1933_s22 = smov %s1444_s23 }
 0x3a3   : > { %s1934_s23 = smov %s1612_s18  ;;  %s1935_s24 = smov %s1452_s25 }
 0x3a4   : > { %s1936_s25 = smov %s1938_s11  ;;  %26 = sbr.rel (!%p24_p10) target bundleno = 11 (0xb), region = 117 }
 0x3ab   :  { %994 = vsyncpa [#allocation3], 1 }
 0x3ac   :  { %996 = vsyncpa [#allocation3 + $0x1], 1 }
 0x3ad   :  { %997 = vsyncpa [#allocation6], 1 }
 0x3ae   :  { %998 = vsyncpa [#allocation4], 1 }
 0x3af   :  { %1000 = vsyncpa [#allocation4 + $0x1], 1 }
 0x3b0   :  { %1001 = vsyncpa [#allocation9], 1 }
 0x3b1   :  { %1003 = vsyncpa [#allocation9 + $0x1], 1 }

</bundles_post_ra>
